<compile_context>
chip_gen: v7x
topology: tpu7x:2x2x1
jax: 0.10.0
libtpu: 0.0.40
codegen_flags: <defaults>
</compile_context>

<pallas_src>
import functools

import jax
import jax.numpy as jnp
from jax.experimental import pallas as pl
from jax.experimental.pallas import tpu as pltpu

LANE = 128       # vreg lane width (last dim)
SUBLANE = 8      # f32 sublane packing


def round_up(x, m):
    return (x + m - 1) // m * m


def cdiv(a, b):
    return -(-a // b)


# ----------------------------------------------------------------------------
# Per-generation configuration (tile budget, scoped-VMEM limit, epilogue dtype)
# ----------------------------------------------------------------------------
def tpu_config():
    kind = ""
    try:
        dev = jax.devices()[0]
        if dev.platform == "tpu":
            kind = dev.device_kind.lower()
    except Exception:
        pass
    vmem_phys = None
    try:
        vmem_phys = int(pltpu.get_tpu_info().vmem_capacity_bytes)
    except Exception:
        vmem_phys = None
    if vmem_phys is None:
        # v5e/v6e have 128 MiB VMEM; v7x has 64 MiB per TensorCore; unknown -> be safe.
        vmem_phys = (128 << 20) if ("v5" in kind or "v6" in kind) else (64 << 20)
    if vmem_phys <= (64 << 20):
        tile_budget, vmem_limit = 20 << 20, 56 << 20      # v7x-class: keep residency
    else:
        tile_budget, vmem_limit = 32 << 20, 96 << 20      # v5e/v6e: bigger tiles amortize step overhead
    # bf16 bias/ReLU epilogue only where the VPU natively supports bf16 (v6e, v7x).
    bf16_epilogue = bool(kind) and not any(t in kind for t in ("v2", "v3", "v4", "v5"))
    return tile_budget, vmem_limit, bf16_epilogue


# ----------------------------------------------------------------------------
# Pallas kernel: folded (1x1 conv + BN) -> ReLU stack, then max over group dim
# ----------------------------------------------------------------------------
def make_msg_mlp_kernel(layer_has_bias, s_tile, k_pad, bf16_epilogue):
    num_layers = len(layer_has_bias)

    def kernel(x_ref, *refs):
        out_ref = refs[-1]
        params = refs[:-1]
        x = x_ref[0]                                     # (s_tile*k_pad, cin_b) bf16
        pi = 0
        for l, has_bias in enumerate(layer_has_bias):
            w = params[pi][...]
            pi += 1
            last = l + 1 == num_layers
            y = jnp.dot(x, w, preferred_element_type=jnp.float32)
            if last or not bf16_epilogue:
                # f32 epilogue (v5e VPU has no bf16; the last layer feeds the f32 max).
                if has_bias:
                    y = y + params[pi][...]
                    pi += 1
                y = jnp.maximum(y, 0.0)
                x = y if last else y.astype(jnp.bfloat16)
            else:
                # bf16 epilogue on bf16-VPU chips (v6e/v7x): halves VALU work + live VMEM.
                y = y.astype(jnp.bfloat16)
                if has_bias:
                    y = y + params[pi][...]
                    pi += 1
                x = jnp.maximum(y, 0)
        cout_p = x.shape[-1]
        # max over the K points of every group (== torch.max(..., dim=2)[0]); k_pad is a
        # multiple of 8 so the reshape stays sublane-aligned and the reduce is XLU work.
        out_ref[0] = jnp.max(x.reshape(s_tile, k_pad, cout_p), axis=1)

    return kernel


def choose_s_tile(s_total, k_pad, cin_b, cmax_p, cout_p, wb_bytes,
                  budget_bytes, min_tiles=1):
    """Largest multiple-of-8 S-tile whose per-step VMEM footprint fits the budget."""
    s_cap = round_up(s_total, SUBLANE)
    if min_tiles > 1:
        # Guarantee >= min_tiles grid steps along S (keeps both v7x TCs busy at B == 1).
        s_cap = min(s_cap, max(SUBLANE, (cdiv(s_total, min_tiles) // SUBLANE) * SUBLANE))
    best = SUBLANE
    ts = SUBLANE
    while ts <= s_cap:
        rows = ts * k_pad
        footprint = (2 * rows * cin_b * 2            # double-buffered bf16 input tile
                     + 2 * ts * cout_p * 4           # double-buffered f32 output tile
                     + rows * cmax_p * (4 + 2 + 2)   # f32 MXU result + bf16 recast + live bf16 src
                     + 2 * wb_bytes                  # double-buffered weights / biases
                     + (2 << 20))                    # Mosaic internal scratch headroom
        if footprint <= budget_bytes:
            best = ts
        ts += SUBLANE
    return best


def run_scale_mlp(grouped, weights, biases, layer_has_bias, s_tile,
                  vmem_limit, bf16_epilogue, cost_estimate):
    """grouped: [B, S_pad, K_p, cin_b] bf16 (natural channel width; last dim == full dim);
       weights[l]: [prev_width, cout_l_p] bf16 (Cout lane-padded to 128);
       biases[l]: [1, cout_l_p] or None (bias already folded into the MXU ones lane)."""
    B, S_pad, K_p, cin_b = grouped.shape
    cout_p = weights[-1].shape[1]
    x = grouped.reshape(B, S_pad * K_p, cin_b)

    in_specs = [pl.BlockSpec((1, s_tile * K_p, cin_b), lambda b, s: (b, s, 0))]
    args = [x]
    for w, bia in zip(weights, biases):
        in_specs.append(pl.BlockSpec(w.shape, lambda b, s: (0, 0)))
        args.append(w)
        if bia is not None:
            in_specs.append(pl.BlockSpec(bia.shape, lambda b, s: (0, 0)))
            args.append(bia)

    return pl.pallas_call(
        make_msg_mlp_kernel(tuple(layer_has_bias), s_tile, K_p, bf16_epilogue),
        out_shape=jax.ShapeDtypeStruct((B, S_pad, cout_p), jnp.float32),
        grid=(B, S_pad // s_tile),
        in_specs=in_specs,
        out_specs=pl.BlockSpec((1, s_tile, cout_p), lambda b, s: (b, s, 0)),
        compiler_params=pltpu.CompilerParams(
            dimension_semantics=("parallel", "parallel"),
            vmem_limit_bytes=vmem_limit,
        ),
        cost_estimate=cost_estimate,
    )(*args)


# ----------------------------------------------------------------------------
# Parameter folding (conv + inference BN -> single matmul), bias-in-MXU trick
# ----------------------------------------------------------------------------
def fold_conv_bn(w_conv, b_conv, gamma, beta, mean, var, eps=1e-5):
    """Fold 1x1 conv ([Cout, Cin]) + inference BatchNorm into W [Cin, Cout], b [Cout]."""
    scale = gamma / jnp.sqrt(var + eps)
    w = (w_conv * scale[:, None]).T
    b = (b_conv - mean) * scale + beta
    return w.astype(jnp.float32), b.astype(jnp.float32)


def build_layer_params(layers, cin, bf16_epilogue):
    """Fold each (conv, BN) pair; pad Cout to 128 lanes; fold the bias into the MXU via
    a constant-1 lane that chains through a spare pad column when one exists."""
    num_layers = len(layers)
    prev_width = cin + 1          # input carries an appended constant-1 bias lane
    prev_ones_col = cin           # column index of that lane, or None if unavailable
    ws, bs, has_bias, dims = [], [], [], []
    for l, (w, b_conv, gamma, beta, mean, var) in enumerate(layers):
        wf, bf = fold_conv_bn(w, b_conv, gamma, beta, mean, var)     # [cin_l,cout_l],[cout_l]
        cin_l, cout_l = wf.shape
        cout_p = round_up(cout_l, LANE)
        is_last = l + 1 == num_layers
        wpad = jnp.zeros((prev_width, cout_p), jnp.float32).at[:cin_l, :cout_l].set(wf)
        if prev_ones_col is not None:
            wpad = wpad.at[prev_ones_col, :cout_l].set(bf)           # bias via the MXU (free)
            bias = None
        else:
            bdt = jnp.float32 if (is_last or not bf16_epilogue) else jnp.bfloat16
            bias = jnp.zeros((1, cout_p), jnp.float32).at[0, :cout_l].set(bf).astype(bdt)
        next_ones_col = None
        if (not is_last) and (cout_p > cout_l) and (prev_ones_col is not None):
            next_ones_col = cout_l                                   # re-emit the ones column
            wpad = wpad.at[prev_ones_col, next_ones_col].set(1.0)
        ws.append(wpad.astype(jnp.bfloat16))
        bs.append(bias)
        has_bias.append(bias is not None)
        dims.append(cout_l)
        prev_width = cout_p
        prev_ones_col = next_ones_col
    return ws, bs, has_bias, dims


# ----------------------------------------------------------------------------
# Plain-JAX glue: FPS, ball query, gathers (not the hot matmul path).
# ----------------------------------------------------------------------------
def furthest_point_sampling(xyz, n_samples):
    """xyz: [B, N, 3] -> indices [B, n_samples] (deterministic, seed index 0)."""
    B, N, _ = xyz.shape

    def step(carry, _):
        dist, farthest = carry
        centroid = jax.vmap(lambda p, i: p[i])(xyz, farthest)            # [B, 3]
        d = jnp.sum((xyz - centroid[:, None, :]) ** 2, axis=-1)          # [B, N]
        dist = jnp.minimum(dist, d)
        nxt = jnp.argmax(dist, axis=-1).astype(jnp.int32)
        return (dist, nxt), farthest

    init = (jnp.full((B, N), 1e10, jnp.float32), jnp.zeros((B,), jnp.int32))
    _, idxs = jax.lax.scan(step, init, None, length=n_samples)
    return jnp.transpose(idxs)  # [B, n_samples]


def ball_query(xyz, centroids, radius, K):
    """xyz [B,N,3], centroids [B,S,3] -> indices [B,S,K] (K smallest in-radius idx)."""
    B, N, _ = xyz.shape
    # TODO(synk): at large N, compute sqrdists in bf16 and/or tile over S to keep this
    # [B,S,N] distance matrix + top_k from dominating once the kernel-side HBM traffic
    # is gone.
    sqrdists = jnp.sum((centroids[:, :, None, :] - xyz[:, None, :, :]) ** 2, axis=-1)
    idx = jnp.broadcast_to(jnp.arange(N, dtype=jnp.int32), sqrdists.shape)
    masked = jnp.where(sqrdists > radius * radius, N, idx)     # out-of-radius -> N
    vals, _ = jax.lax.top_k(N - masked, K)                     # K smallest indices, ascending
    idx_k = N - vals
    first = idx_k[:, :, :1]
    first = jnp.where(first == N, 0, first)                    # zero-in-radius group -> point 0
    return jnp.where(idx_k == N, first, idx_k)                 # always in-bounds


def batch_indexing(data, indices):
    """data [B, N, C], indices [B, ...] -> [B, ..., C]."""
    return jax.vmap(lambda d, i: d[i])(data, indices)


# ----------------------------------------------------------------------------
# Module forward
# ----------------------------------------------------------------------------
def pointnet2_sa_msg_forward(points_xyz, features, params, n_samples,
                             radius_list, n_points_per_group_list):
    B, N, _ = points_xyz.shape
    if features is None:
        features = jnp.zeros((B, N, 0), jnp.float32)
    C = features.shape[-1]
    cin = 3 + C
    S = n_samples

    tile_budget, vmem_limit, bf16_epilogue = tpu_config()

    centroid_indices = furthest_point_sampling(points_xyz, n_samples)
    centroids = batch_indexing(points_xyz, centroid_indices)             # [B, S, 3]

    multi_scale_features = []
    for radius, K, layers in zip(radius_list, n_points_per_group_list, params):
        # NOTE: BatchNorm is applied in inference mode (running stats folded into the
        # conv); the matmul chain runs in bf16 (MXU-native) with f32 accumulation.
        ws, bs, has_bias, dims = build_layer_params(layers, cin, bf16_epilogue)
        cout_last = dims[-1]
        cout_last_p = ws[-1].shape[1]
        cmax_p = max(w.shape[1] for w in ws)
        cin_b = cin + 1                                                   # + constant-1 bias lane
        K_p = round_up(K, SUBLANE)
        wb_bytes = sum(int(w.size) * w.dtype.itemsize for w in ws)
        wb_bytes += sum(int(b.size) * b.dtype.itemsize for b in bs if b is not None)

        s_tile = choose_s_tile(S, K_p, cin_b, cmax_p, cout_last_p, wb_bytes,
                               tile_budget, min_tiles=2 if B == 1 else 1)
        S_pad = round_up(S, s_tile)

        gi = ball_query(points_xyz, centroids, radius, K)                 # [B, S, K]
        # Pad the group axis to a sublane multiple with duplicates of slot 0 (cannot
        # change the max) and the S axis to a tile multiple with rows gathering point 0
        # (sliced off below), so the kernel never needs masking.
        if K_p != K:
            gi = jnp.concatenate(
                [gi, jnp.broadcast_to(gi[:, :, :1], (B, S, K_p - K))], axis=-1)
        cents = centroids
        if S_pad != S:
            gi = jnp.pad(gi, ((0, 0), (0, S_pad - S), (0, 0)))
            cents = jnp.pad(centroids, ((0, 0), (0, S_pad - S), (0, 0)))

        # TODO(synk): fuse this gather + centroid-subtract + concat into the Pallas
        # kernel (per-batch [N, 3+C] cloud resident in VMEM + prefetched indices) to
        # remove the grouped tensor's HBM round trip entirely; kept in XLA because
        # Pallas TPU has no general in-kernel row gather, but the round trip is now
        # bf16 at natural channel width (no 128-lane padding) -> ~18x fewer bytes.
        g_xyz = batch_indexing(points_xyz, gi)                            # [B, S_pad, K_p, 3]
        g_feat = batch_indexing(features, gi)                             # [B, S_pad, K_p, C]
        g_xyz_norm = g_xyz - cents[:, :, None, :]
        ones = jnp.ones((B, S_pad, K_p, 1), jnp.float32)                  # MXU bias lane
        grouped = jnp.concatenate([g_xyz_norm, g_feat, ones],
                                  axis=-1).astype(jnp.bfloat16)           # [B, S_pad, K_p, cin+1]

        # Advisory cost (real, unpadded counts) so XLA overlaps the next scale's
        # ball query / gathers with this scale's kernel.
        in_dims = [cin] + dims[:-1]
        flops = 2 * B * S * K * sum(i * o for i, o in zip(in_dims, dims))
        bytes_accessed = (B * S * K * cin * 2 + B * S * cout_last * 4
                          + sum(int(w.size) * 2 for w in ws))
        cost = pl.CostEstimate(flops=flops, transcendentals=0,
                               bytes_accessed=bytes_accessed)

        out = run_scale_mlp(grouped, ws, bs, has_bias, s_tile,
                            vmem_limit, bf16_epilogue, cost)
        multi_scale_features.append(out[:, :S, :cout_last])               # drop S / lane padding

    return centroids, jnp.concatenate(multi_scale_features, axis=-1)


# ----------------------------------------------------------------------------
# Pure-JAX f32 reference (mirrors the PyTorch module, inference-mode BN)
# ----------------------------------------------------------------------------
def pointnet2_sa_msg_forward_ref(points_xyz, features, params, n_samples,
                                 radius_list, n_points_per_group_list, eps=1e-5):
    B, N, _ = points_xyz.shape
    if features is None:
        features = jnp.zeros((B, N, 0), jnp.float32)
    ci = furthest_point_sampling(points_xyz, n_samples)
    centroids = batch_indexing(points_xyz, ci)
    outs = []
    for radius, K, layers in zip(radius_list, n_points_per_group_list, params):
        gi = ball_query(points_xyz, centroids, radius, K)
        g_xyz = batch_indexing(points_xyz, gi) - centroids[:, :, None, :]
        g_feat = batch_indexing(features, gi)
        x = jnp.concatenate([g_xyz, g_feat], axis=-1)                     # [B,S,K,cin]
        for (w, b_conv, gamma, beta, mean, var) in layers:
            scale = gamma / jnp.sqrt(var + eps)
            x = x @ (w * scale[:, None]).T + ((b_conv - mean) * scale + beta)
            x = jnp.maximum(x, 0.0)
        outs.append(jnp.max(x, axis=2))
    return centroids, jnp.concatenate(outs, axis=-1)


def init_params(key, in_channels, mlp_out_channels_list):
    params = []
    for mlp_out_channels in mlp_out_channels_list:
        layers = []
        last = in_channels
        for cout in mlp_out_channels:
            key, kw, kb = jax.random.split(key, 3)
            w = jax.random.normal(kw, (cout, last), jnp.float32) / jnp.sqrt(float(last))
            b_conv = jax.random.normal(kb, (cout,), jnp.float32) * 0.05
            gamma = jnp.ones((cout,), jnp.float32)      # fresh BatchNorm2d init
            beta = jnp.zeros((cout,), jnp.float32)
            mean = jnp.zeros((cout,), jnp.float32)
            var = jnp.ones((cout,), jnp.float32)
            layers.append((w, b_conv, gamma, beta, mean, var))
            last = cout
        params.append(layers)
    return params


if __name__ == "__main__":
    key = jax.random.PRNGKey(0)
    k_xyz, k_feat, k_params = jax.random.split(key, 3)

    B, N, C_feat = 2, 16, 4
    n_samples = 8
    radius_list = [0.4, 0.8]
    n_points_per_group_list = [8, 16]
    in_channels = 3 + C_feat
    # The second scale includes a 128-wide layer so both bias paths (MXU-folded via the
    # ones lane, and explicit add when no spare pad lane exists) are exercised.
    mlp_out_channels_list = [[16, 32], [128, 32, 64]]

    points_xyz = jax.random.uniform(k_xyz, (B, N, 3), jnp.float32)
    features = jax.random.normal(k_feat, (B, N, C_feat), jnp.float32)
    params = init_params(k_params, in_channels, mlp_out_channels_list)

    fwd = jax.jit(functools.partial(
        pointnet2_sa_msg_forward,
        params=params,
        n_samples=n_samples,
        radius_list=radius_list,
        n_points_per_group_list=n_points_per_group_list,
    ))
    centroids, msf = jax.block_until_ready(fwd(points_xyz, features))

    expected_out_channels = sum(m[-1] for m in mlp_out_channels_list)
    assert centroids.shape == (B, n_samples, 3), centroids.shape
    assert msf.shape == (B, n_samples, expected_out_channels), msf.shape
    assert bool(jnp.all(jnp.isfinite(msf)))

    # Tolerance-asserted pure-JAX f32 reference (the kernel matmuls run in bf16).
    cent_ref, msf_ref = pointnet2_sa_msg_forward_ref(
        points_xyz, features, params, n_samples, radius_list, n_points_per_group_list)
    assert bool(jnp.allclose(centroids, cent_ref)), "centroid mismatch"
    rel_err = float(jnp.max(jnp.abs(msf - msf_ref)) / (jnp.max(jnp.abs(msf_ref)) + 1e-6))
    assert rel_err < 5e-2, f"feature mismatch vs f32 reference, rel_err={rel_err}"

    print("KERNEL_OK")
</pallas_src>

<mosaic_0001>
module attributes {stable_mosaic.version = 11 : i64} {
  func.func @kernel(%arg0: i32, %arg1: i32, %arg2: memref<1x128x8xbf16, #tpu.memory_space<vmem>>, %arg3: memref<8x128xbf16, #tpu.memory_space<vmem>>, %arg4: memref<128x128xbf16, #tpu.memory_space<vmem>>, %arg5: memref<1x128xf32, #tpu.memory_space<vmem>>, %arg6: memref<128x128xbf16, #tpu.memory_space<vmem>>, %arg7: memref<1x128xf32, #tpu.memory_space<vmem>>, %arg8: memref<1x8x128xf32, #tpu.memory_space<vmem>>) attributes {dimension_semantics = [#tpu.dimension_semantics<parallel>, #tpu.dimension_semantics<parallel>], iteration_bounds = array<i64: 2, 1>, scalar_prefetch = 0 : i64, scratch_operands = 0 : i64, tpu.core_type = #tpu.core_type<tc>, window_params = [{transform_indices = @transform_0, window_bounds = array<i64: 1, 128, 8>}, {pipeline_mode = #tpu.pipeline_mode<synchronous>, transform_indices = @transform_1, window_bounds = array<i64: 8, 128>}, {pipeline_mode = #tpu.pipeline_mode<synchronous>, transform_indices = @transform_2, window_bounds = array<i64: 128, 128>}, {pipeline_mode = #tpu.pipeline_mode<synchronous>, transform_indices = @transform_3, window_bounds = array<i64: 1, 128>}, {pipeline_mode = #tpu.pipeline_mode<synchronous>, transform_indices = @transform_4, window_bounds = array<i64: 128, 128>}, {pipeline_mode = #tpu.pipeline_mode<synchronous>, transform_indices = @transform_5, window_bounds = array<i64: 1, 128>}, {transform_indices = @transform_6, window_bounds = array<i64: 1, 8, 128>}]} {
    %c0 = arith.constant 0 : index
    %c0_0 = arith.constant 0 : index
    %c0_1 = arith.constant 0 : index
    %0 = vector.load %arg2[%c0, %c0_0, %c0_1] : memref<1x128x8xbf16, #tpu.memory_space<vmem>>, vector<1x128x8xbf16>
    %1 = vector.shape_cast %0 : vector<1x128x8xbf16> to vector<128x8xbf16>
    %c0_2 = arith.constant 0 : index
    %c0_3 = arith.constant 0 : index
    %2 = vector.load %arg3[%c0_2, %c0_3] : memref<8x128xbf16, #tpu.memory_space<vmem>>, vector<8x128xbf16>
    %cst = arith.constant dense<0.000000e+00> : vector<128x128xf32>
    %3 = tpu.matmul %1, %2, %cst {dimension_numbers = #tpu.dot_dimension_numbers<[1], [0], [0], [1], [0, 0, 1, 1], [], []>} : vector<128x8xbf16>, vector<8x128xbf16>, vector<128x128xf32> -> vector<128x128xf32>
    %cst_4 = arith.constant 0.000000e+00 : f32
    %4 = vector.broadcast %cst_4 : f32 to vector<128x128xf32>
    %5 = arith.maximumf %3, %4 : vector<128x128xf32>
    %6 = arith.truncf %5 : vector<128x128xf32> to vector<128x128xbf16>
    %c0_5 = arith.constant 0 : index
    %c0_6 = arith.constant 0 : index
    %7 = vector.load %arg4[%c0_5, %c0_6] : memref<128x128xbf16, #tpu.memory_space<vmem>>, vector<128x128xbf16>
    %cst_7 = arith.constant dense<0.000000e+00> : vector<128x128xf32>
    %8 = tpu.matmul %6, %7, %cst_7 {dimension_numbers = #tpu.dot_dimension_numbers<[1], [0], [0], [1], [0, 0, 1, 1], [], []>} : vector<128x128xbf16>, vector<128x128xbf16>, vector<128x128xf32> -> vector<128x128xf32>
    %c0_8 = arith.constant 0 : index
    %c0_9 = arith.constant 0 : index
    %9 = vector.load %arg5[%c0_8, %c0_9] : memref<1x128xf32, #tpu.memory_space<vmem>>, vector<1x128xf32>
    %10 = vector.broadcast %9 : vector<1x128xf32> to vector<128x128xf32>
    %11 = arith.addf %8, %10 : vector<128x128xf32>
    %cst_10 = arith.constant 0.000000e+00 : f32
    %12 = vector.broadcast %cst_10 : f32 to vector<128x128xf32>
    %13 = arith.maximumf %11, %12 : vector<128x128xf32>
    %14 = arith.truncf %13 : vector<128x128xf32> to vector<128x128xbf16>
    %c0_11 = arith.constant 0 : index
    %c0_12 = arith.constant 0 : index
    %15 = vector.load %arg6[%c0_11, %c0_12] : memref<128x128xbf16, #tpu.memory_space<vmem>>, vector<128x128xbf16>
    %cst_13 = arith.constant dense<0.000000e+00> : vector<128x128xf32>
    %16 = tpu.matmul %14, %15, %cst_13 {dimension_numbers = #tpu.dot_dimension_numbers<[1], [0], [0], [1], [0, 0, 1, 1], [], []>} : vector<128x128xbf16>, vector<128x128xbf16>, vector<128x128xf32> -> vector<128x128xf32>
    %c0_14 = arith.constant 0 : index
    %c0_15 = arith.constant 0 : index
    %17 = vector.load %arg7[%c0_14, %c0_15] : memref<1x128xf32, #tpu.memory_space<vmem>>, vector<1x128xf32>
    %18 = vector.broadcast %17 : vector<1x128xf32> to vector<128x128xf32>
    %19 = arith.addf %16, %18 : vector<128x128xf32>
    %cst_16 = arith.constant 0.000000e+00 : f32
    %20 = vector.broadcast %cst_16 : f32 to vector<128x128xf32>
    %21 = arith.maximumf %19, %20 : vector<128x128xf32>
    %22 = vector.shape_cast %21 : vector<128x128xf32> to vector<8x16x128xf32>
    %cst_17 = arith.constant dense<0xFF800000> : vector<8x128xf32>
    %23 = vector.multi_reduction <maximumf>, %22, %cst_17 [1] : vector<8x16x128xf32> to vector<8x128xf32>
    %c0_18 = arith.constant 0 : index
    %c0_19 = arith.constant 0 : index
    %c0_20 = arith.constant 0 : index
    %24 = vector.load %arg8[%c0_18, %c0_19, %c0_20] : memref<1x8x128xf32, #tpu.memory_space<vmem>>, vector<1x8x128xf32>
    %25 = vector.shape_cast %24 : vector<1x8x128xf32> to vector<8x128xf32>
    %26 = vector.shape_cast %23 : vector<8x128xf32> to vector<1x8x128xf32>
    tpu.vector_store %arg8[%c0_18, %c0_19, %c0_20], %26 {strides = array<i32>} : memref<1x8x128xf32, #tpu.memory_space<vmem>>, vector<1x8x128xf32>,
    return
  }
  func.func @transform_0(%arg0: i32, %arg1: i32) -> (i32, i32, i32) {
    %c0_i32 = arith.constant 0 : i32
    %c0_i32_0 = arith.constant 0 : i32
    return %arg0, %arg1, %c0_i32 : i32, i32, i32
  }
  func.func @transform_1(%arg0: i32, %arg1: i32) -> (i32, i32) {
    %c0_i32 = arith.constant 0 : i32
    %c0_i32_0 = arith.constant 0 : i32
    %c0_i32_1 = arith.constant 0 : i32
    return %c0_i32, %c0_i32_0 : i32, i32
  }
  func.func @transform_2(%arg0: i32, %arg1: i32) -> (i32, i32) {
    %c0_i32 = arith.constant 0 : i32
    %c0_i32_0 = arith.constant 0 : i32
    %c0_i32_1 = arith.constant 0 : i32
    return %c0_i32, %c0_i32_0 : i32, i32
  }
  func.func @transform_3(%arg0: i32, %arg1: i32) -> (i32, i32) {
    %c0_i32 = arith.constant 0 : i32
    %c0_i32_0 = arith.constant 0 : i32
    %c0_i32_1 = arith.constant 0 : i32
    return %c0_i32, %c0_i32_0 : i32, i32
  }
  func.func @transform_4(%arg0: i32, %arg1: i32) -> (i32, i32) {
    %c0_i32 = arith.constant 0 : i32
    %c0_i32_0 = arith.constant 0 : i32
    %c0_i32_1 = arith.constant 0 : i32
    return %c0_i32, %c0_i32_0 : i32, i32
  }
  func.func @transform_5(%arg0: i32, %arg1: i32) -> (i32, i32) {
    %c0_i32 = arith.constant 0 : i32
    %c0_i32_0 = arith.constant 0 : i32
    %c0_i32_1 = arith.constant 0 : i32
    return %c0_i32, %c0_i32_0 : i32, i32
  }
  func.func @transform_6(%arg0: i32, %arg1: i32) -> (i32, i32, i32) {
    %c0_i32 = arith.constant 0 : i32
    %c0_i32_0 = arith.constant 0 : i32
    return %arg0, %arg1, %c0_i32 : i32, i32, i32
  }
}

module attributes {stable_mosaic.version = 11 : i64} {
  func.func @kernel(%arg0: i32, %arg1: i32, %arg2: memref<1x64x8xbf16, #tpu.memory_space<vmem>>, %arg3: memref<8x128xbf16, #tpu.memory_space<vmem>>, %arg4: memref<128x128xbf16, #tpu.memory_space<vmem>>, %arg5: memref<1x8x128xf32, #tpu.memory_space<vmem>>) attributes {dimension_semantics = [#tpu.dimension_semantics<parallel>, #tpu.dimension_semantics<parallel>], iteration_bounds = array<i64: 2, 1>, scalar_prefetch = 0 : i64, scratch_operands = 0 : i64, tpu.core_type = #tpu.core_type<tc>, window_params = [{transform_indices = @transform_0, window_bounds = array<i64: 1, 64, 8>}, {pipeline_mode = #tpu.pipeline_mode<synchronous>, transform_indices = @transform_1, window_bounds = array<i64: 8, 128>}, {pipeline_mode = #tpu.pipeline_mode<synchronous>, transform_indices = @transform_2, window_bounds = array<i64: 128, 128>}, {transform_indices = @transform_3, window_bounds = array<i64: 1, 8, 128>}]} {
    %c0 = arith.constant 0 : index
    %c0_0 = arith.constant 0 : index
    %c0_1 = arith.constant 0 : index
    %0 = vector.load %arg2[%c0, %c0_0, %c0_1] : memref<1x64x8xbf16, #tpu.memory_space<vmem>>, vector<1x64x8xbf16>
    %1 = vector.shape_cast %0 : vector<1x64x8xbf16> to vector<64x8xbf16>
    %c0_2 = arith.constant 0 : index
    %c0_3 = arith.constant 0 : index
    %2 = vector.load %arg3[%c0_2, %c0_3] : memref<8x128xbf16, #tpu.memory_space<vmem>>, vector<8x128xbf16>
    %cst = arith.constant dense<0.000000e+00> : vector<64x128xf32>
    %3 = tpu.matmul %1, %2, %cst {dimension_numbers = #tpu.dot_dimension_numbers<[1], [0], [0], [1], [0, 0, 1, 1], [], []>} : vector<64x8xbf16>, vector<8x128xbf16>, vector<64x128xf32> -> vector<64x128xf32>
    %cst_4 = arith.constant 0.000000e+00 : f32
    %4 = vector.broadcast %cst_4 : f32 to vector<64x128xf32>
    %5 = arith.maximumf %3, %4 : vector<64x128xf32>
    %6 = arith.truncf %5 : vector<64x128xf32> to vector<64x128xbf16>
    %c0_5 = arith.constant 0 : index
    %c0_6 = arith.constant 0 : index
    %7 = vector.load %arg4[%c0_5, %c0_6] : memref<128x128xbf16, #tpu.memory_space<vmem>>, vector<128x128xbf16>
    %cst_7 = arith.constant dense<0.000000e+00> : vector<64x128xf32>
    %8 = tpu.matmul %6, %7, %cst_7 {dimension_numbers = #tpu.dot_dimension_numbers<[1], [0], [0], [1], [0, 0, 1, 1], [], []>} : vector<64x128xbf16>, vector<128x128xbf16>, vector<64x128xf32> -> vector<64x128xf32>
    %cst_8 = arith.constant 0.000000e+00 : f32
    %9 = vector.broadcast %cst_8 : f32 to vector<64x128xf32>
    %10 = arith.maximumf %8, %9 : vector<64x128xf32>
    %11 = vector.shape_cast %10 : vector<64x128xf32> to vector<8x8x128xf32>
    %cst_9 = arith.constant dense<0xFF800000> : vector<8x128xf32>
    %12 = vector.multi_reduction <maximumf>, %11, %cst_9 [1] : vector<8x8x128xf32> to vector<8x128xf32>
    %c0_10 = arith.constant 0 : index
    %c0_11 = arith.constant 0 : index
    %c0_12 = arith.constant 0 : index
    %13 = vector.load %arg5[%c0_10, %c0_11, %c0_12] : memref<1x8x128xf32, #tpu.memory_space<vmem>>, vector<1x8x128xf32>
    %14 = vector.shape_cast %13 : vector<1x8x128xf32> to vector<8x128xf32>
    %15 = vector.shape_cast %12 : vector<8x128xf32> to vector<1x8x128xf32>
    tpu.vector_store %arg5[%c0_10, %c0_11, %c0_12], %15 {strides = array<i32>} : memref<1x8x128xf32, #tpu.memory_space<vmem>>, vector<1x8x128xf32>,
    return
  }
  func.func @transform_0(%arg0: i32, %arg1: i32) -> (i32, i32, i32) {
    %c0_i32 = arith.constant 0 : i32
    %c0_i32_0 = arith.constant 0 : i32
    return %arg0, %arg1, %c0_i32 : i32, i32, i32
  }
  func.func @transform_1(%arg0: i32, %arg1: i32) -> (i32, i32) {
    %c0_i32 = arith.constant 0 : i32
    %c0_i32_0 = arith.constant 0 : i32
    %c0_i32_1 = arith.constant 0 : i32
    return %c0_i32, %c0_i32_0 : i32, i32
  }
  func.func @transform_2(%arg0: i32, %arg1: i32) -> (i32, i32) {
    %c0_i32 = arith.constant 0 : i32
    %c0_i32_0 = arith.constant 0 : i32
    %c0_i32_1 = arith.constant 0 : i32
    return %c0_i32, %c0_i32_0 : i32, i32
  }
  func.func @transform_3(%arg0: i32, %arg1: i32) -> (i32, i32, i32) {
    %c0_i32 = arith.constant 0 : i32
    %c0_i32_0 = arith.constant 0 : i32
    return %arg0, %arg1, %c0_i32 : i32, i32, i32
  }
}

</mosaic_0001>

<bundles_post_ra>
// kernel: custom-call.12
= control target key start
LH: loop header
LB: loop body
LE: loop exit
PB: predicated region body
PF: predicated region fallthrough
CT: control target
= control target key end

     0   :  { %s6_s0 = inlined_call_operand.vmem [shape: f32[2,16], index: 0, kind: output, shape index: {}]  }

// kernel: custom-call.14
= control target key start
LH: loop header
LB: loop body
LE: loop exit
PB: predicated region body
PF: predicated region fallthrough
CT: control target
= control target key end

     0   :  { %s6_s0 = inlined_call_operand.vmem [shape: s32[8,2], index: 0, kind: output, shape index: {}]  }

// kernel: pointnet2_sa_msg_forward.3
= control target key start
LH: loop header
LB: loop body
LE: loop exit
PB: predicated region body
PF: predicated region fallthrough
CT: control target
= control target key end

     0   :  { %s1303_s21 = smov 0   ;;  %s1305_s22 = smov 0   ;;  %s1423_s0 = inlined_call_operand.vmem [shape: bf16[2,128,8], index: 0, kind: input, shape index: {}]   ;;  %s1424_s1 = inlined_call_operand.vmem [shape: bf16[8,128], index: 1, kind: input, shape index: {}]   ;;  %s1425_s2 = inlined_call_operand.vmem [shape: bf16[128,128], index: 2, kind: input, shape index: {}]   ;;  %s1426_s3 = inlined_call_operand.vmem [shape: f32[1,128], index: 3, kind: input, shape index: {}]   ;;  %s1427_s4 = inlined_call_operand.vmem [shape: bf16[128,128], index: 4, kind: input, shape index: {}]   ;;  %s1428_s5 = inlined_call_operand.vmem [shape: f32[1,128], index: 5, kind: input, shape index: {}]   ;;  %s1429_s6 = inlined_call_operand.vmem [shape: f32[2,8,128], index: 6, kind: output, shape index: {}]  }
   0x1   :  { %s1307_s23 = smov 0  }
   0x2 LB: > { %s28_s24 = sadd.s32 1, %s1262_s22  ;;  %p1031_p0 = scmp.ge.s32.totalorder %s1266_s23, 1  ;;  %s1266_s23 = sphi %s1307_s23, %s16_s23   ;;  %s1262_s22 = sphi %s1305_s22, %s1431_s22   ;;  %s1258_s21 = sphi %s1303_s21, %s1430_s21  }
   0x3   : > { %p30_p1 = scmp.ge.s32.totalorder %s28_s24, 2  ;;  %p233_p2 = scmp.lt.s32.totalorder %s1266_s23, 3 }
   0x5   : > { %s1433_s24 = smov (%p30_p1, %s28_s24), 0  ;;  %p234_p3 = pnand %p1031_p0, %p233_p2 }
   0x6   : > { %v303_v0 = vld [vmem:[%s1424_s1] sm:$0xf] (!%p234_p3)  ;;  %vm369_vm0 = vcmask (!%p234_p3), 1043456   ;;  %p270_p4 = scmp.lt.s32.totalorder (!%p234_p3), %s1258_s21, 1  ;;  %v1229_v3 = vld [vmem:[%s1425_s2 + $0x8] sm:$0xff] (!%p234_p3)   ;;  %v1230_v4 = vld [vmem:[%s1425_s2 + $0x10] sm:$0xff] (!%p234_p3)  }
   0x7   : > { %237 = sbr.rel (%p234_p3) target bundleno = 721 (0x2d1), region = 44  ;;  %v1228_v1 = vld [vmem:[%s1425_s2] sm:$0xff] (!%p234_p3)   ;;  %1195 = vmatprep.subr.msk.bf16.mxu0 (!%p234_p3), %vm369_vm0, %v303_v0  ;;  %v371_v2 = vsel (!%p234_p3), %vm369_vm0, %v303_v0, 0  ;;  %vm344_vm1 = vcmask (!%p234_p3), 64512   ;;  %v1231_v6 = vld [vmem:[%s1425_s2 + $0x18] sm:$0xff] (!%p234_p3)   ;;  %v1233_v12 = vld [vmem:[%s1425_s2 + $0x28] sm:$0xff] (!%p234_p3)  }
   0x8   : > { %1114 = vmatpush3.bf16.msra.mxu0 (!%p234_p3), %v371_v2  ;;  %1131 = vmatprep.subr.bf16.mxu1 (!%p234_p3), %v1228_v1  ;;  %v1232_v9 = vld [vmem:[%s1425_s2 + $0x20] sm:$0xff] (!%p234_p3)   ;;  %v1234_v16 = vld [vmem:[%s1425_s2 + $0x30] sm:$0xff] (!%p234_p3)   ;;  %v1235_v17 = vld [vmem:[%s1425_s2 + $0x38] sm:$0xff] (!%p234_p3)   ;;  %vm934_vm2 = vcmask (!%p234_p3), 1041409   ;;  %vm936_vm3 = vcmask (!%p234_p3), 1042434   ;;  %vm938_vm4 = vcmask (!%p234_p3), 1043459  }
   0x9   : > { %1132 = vmatpush3.bf16.msra.mxu1 (!%p234_p3), %v1228_v1  ;;  %v1236_v18 = vld [vmem:[%s1427_s4] sm:$0xff] (!%p234_p3)   ;;  %v1237_v19 = vld [vmem:[%s1427_s4 + $0x8] sm:$0xff] (!%p234_p3)   ;;  %v1238_v20 = vld [vmem:[%s1427_s4 + $0x10] sm:$0xff] (!%p234_p3)   ;;  %vm940_vm5 = vcmask (!%p234_p3), 1044484   ;;  %vm942_vm6 = vcmask (!%p234_p3), 1045509   ;;  %vm944_vm7 = vcmask (!%p234_p3), 1046534  }
   0xa   : > { %1133 = vmatprep.subr.bf16.mxu1 (!%p234_p3), %v1229_v3  ;;  %1163 = vmatprep.subr.bf16.mxu0 (!%p234_p3), %v1236_v18  ;;  %v1239_v21 = vld [vmem:[%s1427_s4 + $0x18] sm:$0xff] (!%p234_p3)   ;;  %v1240_v22 = vld [vmem:[%s1427_s4 + $0x20] sm:$0xff] (!%p234_p3)   ;;  %v1241_v23 = vld [vmem:[%s1427_s4 + $0x28] sm:$0xff] (!%p234_p3)   ;;  %vm946_vm8 = vcmask (!%p234_p3), 1047559  }
   0xb   : > { %v1242_v0 = vld [vmem:[%s1427_s4 + $0x30] sm:$0xff] (!%p234_p3)   ;;  %v1243_v1 = vld [vmem:[%s1427_s4 + $0x38] sm:$0xff] (!%p234_p3)   ;;  %v1051_v2 = vld [vmem:[%s1426_s3] ss:$0 sm:$0xff] (!%p234_p3) }
   0xd   : > { %1134 = vmatpush3.bf16.msra.mxu1 (!%p234_p3), %v1229_v3 }
   0xe   : > { %s1435_s21 = smov (!%p270_p4, %s1258_s21), 1  ;;  %1135 = vmatprep.subr.bf16.mxu1 %v1230_v4 }
   0xf   : > { %s1071_s7 = sshll.u32 %s1435_s21, 6  ;;  %s1034_s27 = sshll.u32 %s1435_s21, 3 }
  0x10   : > { %s277_s12 = scalar_lea.vmem %s1423_s0, %s1071_s7  ;;  %s285_s30 = scalar_lea.vmem %s1429_s6, %s1034_s27 }
  0x11   : > { %v1220_v5 = vld [vmem:[%s277_s12] sm:$0xff]   ;;  %v1221_v7 = vld [vmem:[%s277_s12 + $0x8] sm:$0xff]   ;;  %v1222_v8 = vld [vmem:[%s277_s12 + $0x10] sm:$0xff]   ;;  %1136 = vmatpush3.bf16.msra.mxu1 %v1230_v4 }
  0x12   : > { %1115 = vmatprep.mubr.msk.bf16.mxu0 %vm344_vm1, %v1220_v5  ;;  %v1223_v10 = vld [vmem:[%s277_s12 + $0x18] sm:$0xff]   ;;  %1137 = vmatprep.subr.bf16.mxu1 %v1231_v6  ;;  %v1224_v11 = vld [vmem:[%s277_s12 + $0x20] sm:$0xff]   ;;  %v1225_v13 = vld [vmem:[%s277_s12 + $0x28] sm:$0xff]  }
  0x13   : > { %1116 = vmatmul.mubr.msk.bf16.vlgmr.msra.gmra.mrb[0].mxu0 %vm344_vm1, %v1221_v7  ;;  %v1226_v14 = vld [vmem:[%s277_s12 + $0x30] sm:$0xff]   ;;  %v1227_v15 = vld [vmem:[%s277_s12 + $0x38] sm:$0xff]  }
  0x14   : > { %1119 = vmatprep.mubr.msk.bf16.mxu0 %vm344_vm1, %v1222_v8  ;;  %1164 = vmatpush3.bf16.msra.mxu0 %v1236_v18 }
  0x15   : > { %1138 = vmatpush3.bf16.msra.mxu1 %v1231_v6  ;;  %1165 = vmatprep.subr.bf16.mxu0 %v1237_v19 }
  0x16   : > { %1139 = vmatprep.subr.bf16.mxu1 %v1232_v9 }
  0x18   : > { %1166 = vmatpush3.bf16.msra.mxu0 %v1237_v19 }
  0x19   : > { %1140 = vmatpush3.bf16.msra.mxu1 %v1232_v9  ;;  %1167 = vmatprep.subr.bf16.mxu0 %v1238_v20 }
  0x1a   : > { %1141 = vmatprep.subr.bf16.mxu1 %v1233_v12 }
  0x1b   : > { %1120 = vmatmul.mubr.msk.bf16.gmra.mrb[4].mxu0 %vm344_vm1, %v1223_v10 }
  0x1c   : > { %1123 = vmatprep.mubr.msk.bf16.mxu0 %vm344_vm1, %v1224_v11  ;;  %1168 = vmatpush3.bf16.msra.mxu0 %v1238_v20 }
  0x1d   : > { %1142 = vmatpush3.bf16.msra.mxu1 %v1233_v12  ;;  %1169 = vmatprep.subr.bf16.mxu0 %v1239_v21 }
  0x1e   : > { %1143 = vmatprep.subr.bf16.mxu1 %v1234_v16 }
  0x20   : > { %1170 = vmatpush3.bf16.msra.mxu0 %v1239_v21 }
  0x21   : > { %1144 = vmatpush3.bf16.msra.mxu1 %v1234_v16  ;;  %1171 = vmatprep.subr.bf16.mxu0 %v1240_v22 }
  0x22   : > { %1145 = vmatprep.subr.bf16.mxu1 %v1235_v17 }
  0x23   : > { %1124 = vmatmul.mubr.msk.bf16.gmra.mrb[8].mxu0 %vm344_vm1, %v1225_v13 }
  0x24   : > { %1127 = vmatprep.mubr.msk.bf16.mxu0 %vm344_vm1, %v1226_v14  ;;  %1172 = vmatpush3.bf16.msra.mxu0 %v1240_v22 }
  0x25   : > { %1146 = vmatpush3.bf16.msra.mxu1 %v1235_v17  ;;  %1173 = vmatprep.subr.bf16.mxu0 %v1241_v23 }
  0x28   : > { %1174 = vmatpush3.bf16.msra.mxu0 %v1241_v23 }
  0x29   : > { %1175 = vmatprep.subr.bf16.mxu0 %v1242_v0 }
  0x2b   : > { %1128 = vmatmul.mubr.msk.bf16.gmra.mrb[12].mxu0 %vm344_vm1, %v1227_v15 }
  0x2c   : > { %1176 = vmatpush3.bf16.msra.mxu0 %v1242_v0 }
  0x2d   : > { %1177 = vmatprep.subr.bf16.mxu0 %v1243_v1 }
  0x30   : > { %1178 = vmatpush3.bf16.msra.mxu0 %v1243_v1 }
  0xe6   : > { %v1117_v24 = vpop.f32.mrb[0].mxu0 }
  0xe7   : > { %v407_v25 = vpop.f32.mrb[1].mxu0  ;;  %v472_v27 = vmax.f32 %v1117_v24, 0.0 }
  0xe8   : > { %v1118_v26 = vpop.f32.mrb[2].mxu0  ;;  %v470_v30 = vmax.f32 %v407_v25, 0.0 }
  0xe9   : > { %v473_v28 = vmax.f32 %v1118_v26, 0.0  ;;  %v410_v29 = vpop.f32.mrb[3].mxu0 }
  0xea   : > { %v471_v31 = vmax.f32 %v410_v29, 0.0 }
  0xeb   : > { %v487_v32 = vpack.c.bf16 %v473_v28, %v472_v27 }
  0xec   : > { %v486_v33 = vpack.c.bf16 %v471_v31, %v470_v30 }
  0xee   : > { %v1121_v34 = vpop.f32.mrb[4].mxu0  ;;  %1147 = vmatprep.mubr.bf16.mxu1 %v486_v33 }
  0xef   : > { %v423_v35 = vpop.f32.mrb[5].mxu0  ;;  %1148 = vmatmul.mubr.bf16.vlgmr.msra.gmra.mrb[0].mxu1 %v487_v32  ;;  %v476_v37 = vmax.f32 %v1121_v34, 0.0 }
  0xf0   : > { %v1122_v36 = vpop.f32.mrb[6].mxu0  ;;  %v474_v40 = vmax.f32 %v423_v35, 0.0 }
  0xf1   : > { %v477_v38 = vmax.f32 %v1122_v36, 0.0  ;;  %v426_v39 = vpop.f32.mrb[7].mxu0 }
  0xf2   : > { %v475_v41 = vmax.f32 %v426_v39, 0.0 }
  0xf3   : > { %v489_v42 = vpack.c.bf16 %v477_v38, %v476_v37 }
  0xf4   : > { %v488_v43 = vpack.c.bf16 %v475_v41, %v474_v40 }
  0xf6   : > { %v1125_v44 = vpop.f32.mrb[8].mxu0  ;;  %1151 = vmatprep.mubr.bf16.mxu1 %v488_v43 }
  0xf7   : > { %v439_v45 = vpop.f32.mrb[9].mxu0  ;;  %1152 = vmatmul.mubr.bf16.gmra.mrb[4].mxu1 %v489_v42  ;;  %v480_v47 = vmax.f32 %v1125_v44, 0.0 }
  0xf8   : > { %v1126_v46 = vpop.f32.mrb[10].mxu0  ;;  %v478_v50 = vmax.f32 %v439_v45, 0.0 }
  0xf9   : > { %v481_v48 = vmax.f32 %v1126_v46, 0.0  ;;  %v442_v49 = vpop.f32.mrb[11].mxu0 }
  0xfa   : > { %v479_v51 = vmax.f32 %v442_v49, 0.0 }
  0xfb   : > { %v491_v52 = vpack.c.bf16 %v481_v48, %v480_v47 }
  0xfc   : > { %v490_v53 = vpack.c.bf16 %v479_v51, %v478_v50 }
  0xfe   : > { %v1129_v54 = vpop.f32.mrb[12].mxu0  ;;  %1155 = vmatprep.mubr.bf16.mxu1 %v490_v53 }
  0xff   : > { %v455_v55 = vpop.f32.mrb[13].mxu0  ;;  %1156 = vmatmul.mubr.bf16.gmra.mrb[8].mxu1 %v491_v52  ;;  %v484_v57 = vmax.f32 %v1129_v54, 0.0 }
 0x100   : > { %v1130_v56 = vpop.f32.mrb[14].mxu0  ;;  %v482_v60 = vmax.f32 %v455_v55, 0.0 }
 0x101   : > { %v485_v58 = vmax.f32 %v1130_v56, 0.0  ;;  %v458_v59 = vpop.f32.mrb[15].mxu0 }
 0x102   : > { %v483_v61 = vmax.f32 %v458_v59, 0.0  ;;  %v1392_v59 = vld [vmem:[%s1428_s5] ss:$0 sm:$0xff] }
 0x103   : > { %v493_v62 = vpack.c.bf16 %v485_v58, %v484_v57 }
 0x104   : > { %v492_v63 = vpack.c.bf16 %v483_v61, %v482_v60 }
 0x106   : > { %1159 = vmatprep.mubr.bf16.mxu1 %v492_v63 }
 0x107   : > { %1160 = vmatmul.mubr.bf16.gmra.mrb[12].mxu1 %v493_v62 }
 0x1c2   : > { %v1149_v3 = vpop.f32.mrb[0].mxu1 }
 0x1c3   : > { %v608_v4 = vadd.f32 %v1149_v3, %v1051_v2  ;;  %v599_v5 = vpop.f32.mrb[1].mxu1 }
 0x1c4   : > { %v600_v6 = vadd.f32 %v1051_v2, %v599_v5  ;;  %v1150_v7 = vpop.f32.mrb[2].mxu1 }
 0x1c5   : > { %v611_v8 = vadd.f32 %v1150_v7, %v1051_v2  ;;  %v602_v9 = vpop.f32.mrb[3].mxu1  ;;  %v664_v11 = vmax.f32 %v608_v4, 0.0 }
 0x1c6   : > { %v603_v10 = vadd.f32 %v1051_v2, %v602_v9  ;;  %v662_v13 = vmax.f32 %v600_v6, 0.0 }
 0x1c7   : > { %v665_v12 = vmax.f32 %v611_v8, 0.0 }
 0x1c8   : > { %v663_v14 = vmax.f32 %v603_v10, 0.0 }
 0x1c9   : > { %v679_v15 = vpack.c.bf16 %v665_v12, %v664_v11 }
 0x1ca   : > { %v678_v16 = vpack.c.bf16 %v663_v14, %v662_v13  ;;  %v1153_v17 = vpop.f32.mrb[4].mxu1 }
 0x1cb   : > { %v624_v18 = vadd.f32 %v1153_v17, %v1051_v2  ;;  %v615_v19 = vpop.f32.mrb[5].mxu1 }
 0x1cc   : > { %v616_v20 = vadd.f32 %v1051_v2, %v615_v19  ;;  %v1154_v21 = vpop.f32.mrb[6].mxu1  ;;  %1179 = vmatprep.mubr.bf16.mxu0 %v678_v16 }
 0x1cd   : > { %v627_v22 = vadd.f32 %v1154_v21, %v1051_v2  ;;  %v618_v23 = vpop.f32.mrb[7].mxu1  ;;  %1180 = vmatmul.mubr.bf16.vlgmr.msra.gmra.mrb[16].mxu0 %v679_v15  ;;  %v668_v25 = vmax.f32 %v624_v18, 0.0 }
 0x1ce   : > { %v619_v24 = vadd.f32 %v1051_v2, %v618_v23  ;;  %v666_v27 = vmax.f32 %v616_v20, 0.0 }
 0x1cf   : > { %v669_v26 = vmax.f32 %v627_v22, 0.0 }
 0x1d0   : > { %v667_v28 = vmax.f32 %v619_v24, 0.0 }
 0x1d1   : > { %v681_v29 = vpack.c.bf16 %v669_v26, %v668_v25 }
 0x1d2   : > { %v680_v30 = vpack.c.bf16 %v667_v28, %v666_v27  ;;  %v1157_v31 = vpop.f32.mrb[8].mxu1 }
 0x1d3   : > { %v640_v32 = vadd.f32 %v1157_v31, %v1051_v2  ;;  %v631_v33 = vpop.f32.mrb[9].mxu1 }
 0x1d4   : > { %v632_v34 = vadd.f32 %v1051_v2, %v631_v33  ;;  %v1158_v35 = vpop.f32.mrb[10].mxu1  ;;  %1183 = vmatprep.mubr.bf16.mxu0 %v680_v30 }
 0x1d5   : > { %v643_v36 = vadd.f32 %v1158_v35, %v1051_v2  ;;  %v634_v37 = vpop.f32.mrb[11].mxu1  ;;  %1184 = vmatmul.mubr.bf16.gmra.mrb[20].mxu0 %v681_v29  ;;  %v672_v39 = vmax.f32 %v640_v32, 0.0 }
 0x1d6   : > { %v635_v38 = vadd.f32 %v1051_v2, %v634_v37  ;;  %v670_v41 = vmax.f32 %v632_v34, 0.0 }
 0x1d7   : > { %v673_v40 = vmax.f32 %v643_v36, 0.0 }
 0x1d8   : > { %v671_v42 = vmax.f32 %v635_v38, 0.0 }
 0x1d9   : > { %v683_v43 = vpack.c.bf16 %v673_v40, %v672_v39 }
 0x1da   : > { %v682_v44 = vpack.c.bf16 %v671_v42, %v670_v41  ;;  %v1161_v45 = vpop.f32.mrb[12].mxu1 }
 0x1db   : > { %v656_v46 = vadd.f32 %v1161_v45, %v1051_v2  ;;  %v647_v47 = vpop.f32.mrb[13].mxu1 }
 0x1dc   : > { %v648_v48 = vadd.f32 %v1051_v2, %v647_v47  ;;  %v1162_v49 = vpop.f32.mrb[14].mxu1  ;;  %1187 = vmatprep.mubr.bf16.mxu0 %v682_v44 }
 0x1dd   : > { %v659_v50 = vadd.f32 %v1162_v49, %v1051_v2  ;;  %v650_v51 = vpop.f32.mrb[15].mxu1  ;;  %1188 = vmatmul.mubr.bf16.gmra.mrb[24].mxu0 %v683_v43  ;;  %v676_v53 = vmax.f32 %v656_v46, 0.0 }
 0x1de   : > { %v651_v52 = vadd.f32 %v1051_v2, %v650_v51  ;;  %v674_v55 = vmax.f32 %v648_v48, 0.0 }
 0x1df   : > { %v677_v54 = vmax.f32 %v659_v50, 0.0 }
 0x1e0   : > { %v675_v56 = vmax.f32 %v651_v52, 0.0 }
 0x1e1   : > { %v685_v57 = vpack.c.bf16 %v677_v54, %v676_v53 }
 0x1e2   : > { %v684_v58 = vpack.c.bf16 %v675_v56, %v674_v55 }
 0x1e4   : > { %1191 = vmatprep.mubr.bf16.mxu0 %v684_v58 }
 0x1e5   : > { %1192 = vmatmul.mubr.bf16.gmra.mrb[28].mxu0 %v685_v57 }
 0x2a0   : > { %v1181_v60 = vpop.f32.mrb[16].mxu0 }
 0x2a1   : > { %v800_v61 = vadd.f32 %v1181_v60, %v1392_v59  ;;  %v791_v62 = vpop.f32.mrb[17].mxu0 }
 0x2a2   : > { %v792_v63 = vadd.f32 %v1392_v59, %v791_v62  ;;  %v1182_v0 = vpop.f32.mrb[18].mxu0 }
 0x2a3   : > { %v803_v1 = vadd.f32 %v1182_v0, %v1392_v59  ;;  %v794_v2 = vpop.f32.mrb[19].mxu0  ;;  %v856_v4 = vmax.f32 %v800_v61, 0.0 }
 0x2a4   : > { %v795_v3 = vadd.f32 %v1392_v59, %v794_v2  ;;  %v854_v6 = vmax.f32 %v792_v63, 0.0 }
 0x2a5   : > { %v857_v5 = vmax.f32 %v803_v1, 0.0 }
 0x2a6   : > { %v855_v7 = vmax.f32 %v795_v3, 0.0 }
 0x2a7   : > { %v877_v8 = vmax.f32 %v856_v4, %v857_v5 }
 0x2a8   : > { %v870_v9 = vmax.f32 %v854_v6, %v855_v7  ;;  %v1185_v10 = vpop.f32.mrb[20].mxu0 }
 0x2a9   : > { %v878_v11 = vrot.slane %v877_v8, 4  ;;  %v816_v12 = vadd.f32 %v1185_v10, %v1392_v59  ;;  %v807_v13 = vpop.f32.mrb[21].mxu0 }
 0x2aa   : > { %v871_v14 = vrot.slane %v870_v9, 4  ;;  %v808_v15 = vadd.f32 %v1392_v59, %v807_v13  ;;  %v1186_v16 = vpop.f32.mrb[22].mxu0 }
 0x2ab   : > { %v879_v17 = vmax.f32 %v877_v8, %v878_v11  ;;  %v819_v18 = vadd.f32 %v1186_v16, %v1392_v59  ;;  %v810_v19 = vpop.f32.mrb[23].mxu0  ;;  %v860_v23 = vmax.f32 %v816_v12, 0.0 }
 0x2ac   : > { %v872_v20 = vmax.f32 %v870_v9, %v871_v14  ;;  %v811_v21 = vadd.f32 %v1392_v59, %v810_v19  ;;  %v858_v26 = vmax.f32 %v808_v15, 0.0 }
 0x2ad   : > { %v880_v22 = vrot.slane %v879_v17, 2  ;;  %v861_v24 = vmax.f32 %v819_v18, 0.0 }
 0x2ae   : > { %v873_v25 = vrot.slane %v872_v20, 2  ;;  %v859_v27 = vmax.f32 %v811_v21, 0.0 }
 0x2af   : > { %v881_v28 = vmax.f32 %v879_v17, %v880_v22  ;;  %v891_v29 = vmax.f32 %v860_v23, %v861_v24 }
 0x2b0   : > { %v874_v30 = vmax.f32 %v872_v20, %v873_v25  ;;  %v884_v31 = vmax.f32 %v858_v26, %v859_v27  ;;  %v1189_v32 = vpop.f32.mrb[24].mxu0 }
 0x2b1   : > { %v882_v33 = vrot.slane %v881_v28, 1  ;;  %v892_v34 = vrot.slane %v891_v29, 4  ;;  %v832_v35 = vadd.f32 %v1189_v32, %v1392_v59  ;;  %v823_v36 = vpop.f32.mrb[25].mxu0 }
 0x2b2   : > { %v875_v37 = vrot.slane %v874_v30, 1  ;;  %v885_v38 = vrot.slane %v884_v31, 4  ;;  %v824_v39 = vadd.f32 %v1392_v59, %v823_v36  ;;  %v1190_v40 = vpop.f32.mrb[26].mxu0 }
 0x2b3   : > { %v883_v41 = vmax.f32 %v881_v28, %v882_v33  ;;  %v893_v42 = vmax.f32 %v891_v29, %v892_v34  ;;  %v835_v43 = vadd.f32 %v1190_v40, %v1392_v59  ;;  %v826_v44 = vpop.f32.mrb[27].mxu0  ;;  %v864_v49 = vmax.f32 %v832_v35, 0.0 }
 0x2b4   : > { %v876_v45 = vmax.f32 %v874_v30, %v875_v37  ;;  %v886_v46 = vmax.f32 %v884_v31, %v885_v38  ;;  %v827_v47 = vadd.f32 %v1392_v59, %v826_v44  ;;  %v862_v53 = vmax.f32 %v824_v39, 0.0 }
 0x2b5   : > { %v894_v48 = vrot.slane %v893_v42, 2  ;;  %v865_v50 = vmax.f32 %v835_v43, 0.0 }
 0x2b6   : > { %v935_v51 = vsel %vm934_vm2, %v883_v41, %v876_v45  ;;  %v887_v52 = vrot.slane %v886_v46, 2  ;;  %v863_v54 = vmax.f32 %v827_v47, 0.0 }
 0x2b7   : > { %v895_v55 = vmax.f32 %v893_v42, %v894_v48  ;;  %v905_v56 = vmax.f32 %v864_v49, %v865_v50 }
 0x2b8   : > { %v888_v57 = vmax.f32 %v886_v46, %v887_v52  ;;  %v898_v58 = vmax.f32 %v862_v53, %v863_v54  ;;  %v1193_v60 = vpop.f32.mrb[28].mxu0 }
 0x2b9   : > { %v896_v61 = vrot.slane %v895_v55, 1  ;;  %v906_v62 = vrot.slane %v905_v56, 4  ;;  %v848_v63 = vadd.f32 %v1193_v60, %v1392_v59  ;;  %v839_v0 = vpop.f32.mrb[29].mxu0 }
 0x2ba   : > { %v889_v1 = vrot.slane %v888_v57, 1  ;;  %v899_v2 = vrot.slane %v898_v58, 4  ;;  %v840_v3 = vadd.f32 %v1392_v59, %v839_v0  ;;  %v1194_v4 = vpop.f32.mrb[30].mxu0 }
 0x2bb   : > { %v907_v5 = vmax.f32 %v905_v56, %v906_v62  ;;  %v851_v6 = vadd.f32 %v1194_v4, %v1392_v59  ;;  %v842_v7 = vpop.f32.mrb[31].mxu0  ;;  %v897_v11 = vmax.f32 %v895_v55, %v896_v61  ;;  %v868_v13 = vmax.f32 %v848_v63, 0.0 }
 0x2bc   : > { %v890_v8 = vmax.f32 %v888_v57, %v889_v1  ;;  %v900_v9 = vmax.f32 %v898_v58, %v899_v2  ;;  %v843_v10 = vadd.f32 %v1392_v59, %v842_v7  ;;  %v866_v17 = vmax.f32 %v840_v3, 0.0 }
 0x2bd   : > { %v908_v12 = vrot.slane %v907_v5, 2  ;;  %v869_v14 = vmax.f32 %v851_v6, 0.0 }
 0x2be   : > { %v937_v15 = vsel %vm936_vm3, %v890_v8, %v935_v51  ;;  %v901_v16 = vrot.slane %v900_v9, 2  ;;  %v867_v18 = vmax.f32 %v843_v10, 0.0 }
 0x2bf   : > { %v909_v19 = vmax.f32 %v907_v5, %v908_v12  ;;  %v939_v20 = vsel %vm938_vm4, %v897_v11, %v937_v15  ;;  %v919_v21 = vmax.f32 %v868_v13, %v869_v14 }
 0x2c0   : > { %v902_v22 = vmax.f32 %v900_v9, %v901_v16  ;;  %v912_v23 = vmax.f32 %v866_v17, %v867_v18 }
 0x2c1   : > { %v910_v24 = vrot.slane %v909_v19, 1  ;;  %v920_v25 = vrot.slane %v919_v21, 4 }
 0x2c2   : > { %v903_v26 = vrot.slane %v902_v22, 1  ;;  %v913_v27 = vrot.slane %v912_v23, 4 }
 0x2c3   : > { %v921_v59 = vmax.f32 %v919_v21, %v920_v25  ;;  %v911_v30 = vmax.f32 %v909_v19, %v910_v24 }
 0x2c4   : > { %v904_v28 = vmax.f32 %v902_v22, %v903_v26  ;;  %v914_v29 = vmax.f32 %v912_v23, %v913_v27 }
 0x2c5   : > { %v922_v31 = vrot.slane %v921_v59, 2 }
 0x2c6   : > { %v941_v32 = vsel %vm940_vm5, %v904_v28, %v939_v20  ;;  %v915_v33 = vrot.slane %v914_v29, 2 }
 0x2c7   : > { %v923_v34 = vmax.f32 %v921_v59, %v922_v31  ;;  %v943_v35 = vsel %vm942_vm6, %v911_v30, %v941_v32 }
 0x2c8   : > { %v916_v36 = vmax.f32 %v914_v29, %v915_v33 }
 0x2c9   : > { %v924_v37 = vrot.slane %v923_v34, 1 }
 0x2ca   : > { %v917_v38 = vrot.slane %v916_v36, 1 }
 0x2cb   : > { %v925_v40 = vmax.f32 %v923_v34, %v924_v37 }
 0x2cc   : > { %v918_v39 = vmax.f32 %v916_v36, %v917_v38 }
 0x2ce   : > { %v945_v41 = vsel %vm944_vm7, %v918_v39, %v943_v35 }
 0x2cf   : > { %v947_v42 = vsel %vm946_vm8, %v925_v40, %v945_v41 }
 0x2d0   : > { %949 = vst [vmem:[%s285_s30] sm:$0xff] %v947_v42 }
 0x2d1 PF: > { %s16_s23 = sadd.s32 1, %s1266_s23   ;;  %s1430_s21 = smov %s1262_s22 }
 0x2d2   : > { %p13_p5 = scmp.ge.s32.totalorder %s16_s23, 4   ;;  %s1431_s22 = smov %s1433_s24 }
 0x2d4   :  { %15 = sbr.rel (!%p13_p5) target bundleno = 2 (0x2), region = 74 }

// kernel: pointnet2_sa_msg_forward.2
= control target key start
LH: loop header
LB: loop body
LE: loop exit
PB: predicated region body
PF: predicated region fallthrough
CT: control target
= control target key end

     0   :  { %s790_s12 = smov 0   ;;  %s792_s13 = smov 0   ;;  %s858_s0 = inlined_call_operand.vmem [shape: bf16[2,64,8], index: 0, kind: input, shape index: {}]   ;;  %s859_s1 = inlined_call_operand.vmem [shape: bf16[8,128], index: 1, kind: input, shape index: {}]   ;;  %s860_s2 = inlined_call_operand.vmem [shape: bf16[128,128], index: 2, kind: input, shape index: {}]   ;;  %s861_s3 = inlined_call_operand.vmem [shape: f32[2,8,128], index: 3, kind: output, shape index: {}]  }
   0x1   :  { %s794_s14 = smov 0  }
   0x2 LB: > { %s25_s15 = sadd.s32 1, %s764_s13  ;;  %p619_p0 = scmp.ge.s32.totalorder %s768_s14, 1  ;;  %s768_s14 = sphi %s794_s14, %s13_s14   ;;  %s764_s13 = sphi %s792_s13, %s863_s13   ;;  %s760_s12 = sphi %s790_s12, %s862_s12  }
   0x3   : > { %p27_p1 = scmp.ge.s32.totalorder %s25_s15, 2  ;;  %p158_p2 = scmp.lt.s32.totalorder %s768_s14, 3 }
   0x5   : > { %s865_s15 = smov (%p27_p1, %s25_s15), 0  ;;  %p159_p3 = pnand %p619_p0, %p158_p2 }
   0x6   : > { %v214_v0 = vld [vmem:[%s859_s1] sm:$0xf] (!%p159_p3)  ;;  %vm248_vm0 = vcmask (!%p159_p3), 1043456   ;;  %p189_p4 = scmp.lt.s32.totalorder (!%p159_p3), %s760_s12, 1  ;;  %v739_v3 = vld [vmem:[%s860_s2 + $0x8] sm:$0xff] (!%p159_p3)   ;;  %vm235_vm1 = vcmask (!%p159_p3), 64512  }
   0x7   : > { %162 = sbr.rel (%p159_p3) target bundleno = 480 (0x1e0), region = 32  ;;  %v738_v1 = vld [vmem:[%s860_s2] sm:$0xff] (!%p159_p3)   ;;  %709 = vmatprep.subr.msk.bf16.mxu0 (!%p159_p3), %vm248_vm0, %v214_v0  ;;  %v250_v2 = vsel (!%p159_p3), %vm248_vm0, %v214_v0, 0  ;;  %v740_v4 = vld [vmem:[%s860_s2 + $0x10] sm:$0xff] (!%p159_p3)   ;;  %v741_v8 = vld [vmem:[%s860_s2 + $0x18] sm:$0xff] (!%p159_p3)   ;;  %vm522_vm2 = vcmask (!%p159_p3), 1041409  }
   0x8   : > { %660 = vmatpush3.bf16.msra.mxu0 (!%p159_p3), %v250_v2  ;;  %693 = vmatprep.subr.bf16.mxu1 (!%p159_p3), %v738_v1  ;;  %v742_v10 = vld [vmem:[%s860_s2 + $0x20] sm:$0xff] (!%p159_p3)   ;;  %v743_v11 = vld [vmem:[%s860_s2 + $0x28] sm:$0xff] (!%p159_p3)   ;;  %v744_v12 = vld [vmem:[%s860_s2 + $0x30] sm:$0xff] (!%p159_p3)   ;;  %vm524_vm3 = vcmask (!%p159_p3), 1042434   ;;  %vm526_vm4 = vcmask (!%p159_p3), 1043459   ;;  %vm528_vm5 = vcmask (!%p159_p3), 1044484  }
   0x9   : > { %669 = vmatprep.subr.bf16.mxu0 (!%p159_p3), %v738_v1  ;;  %701 = vmatpush3.bf16.msra.mxu1 (!%p159_p3), %v738_v1  ;;  %v745_v13 = vld [vmem:[%s860_s2 + $0x38] sm:$0xff] (!%p159_p3)   ;;  %vm530_vm6 = vcmask (!%p159_p3), 1045509   ;;  %vm532_vm7 = vcmask (!%p159_p3), 1046534   ;;  %vm534_vm8 = vcmask (!%p159_p3), 1047559  }
   0xa   : > { %694 = vmatprep.subr.bf16.mxu1 (!%p159_p3), %v739_v3 }
   0xd   : > { %702 = vmatpush3.bf16.msra.mxu1 (!%p159_p3), %v739_v3 }
   0xe   : > { %s867_s12 = smov (!%p189_p4, %s760_s12), 1  ;;  %695 = vmatprep.subr.bf16.mxu1 %v740_v4 }
   0xf   : > { %s641_s22 = sshll.u32 %s867_s12, 5  ;;  %s622_s11 = sshll.u32 %s867_s12, 3 }
  0x10   : > { %s196_s25 = scalar_lea.vmem %s858_s0, %s641_s22  ;;  %s204_s18 = scalar_lea.vmem %s861_s3, %s622_s11 }
  0x11   : > { %v734_v5 = vld [vmem:[%s196_s25] sm:$0xff]   ;;  %v735_v6 = vld [vmem:[%s196_s25 + $0x8] sm:$0xff]   ;;  %v736_v7 = vld [vmem:[%s196_s25 + $0x10] sm:$0xff]   ;;  %703 = vmatpush3.bf16.msra.mxu1 %v740_v4 }
  0x12   : > { %661 = vmatprep.mubr.msk.bf16.mxu0 %vm235_vm1, %v734_v5  ;;  %696 = vmatprep.subr.bf16.mxu1 %v741_v8  ;;  %v737_v9 = vld [vmem:[%s196_s25 + $0x18] sm:$0xff]  }
  0x13   : > { %662 = vmatmul.mubr.msk.bf16.vlgmr.msra.gmra.mrb[0].mxu0 %vm235_vm1, %v735_v6 }
  0x14   : > { %665 = vmatprep.mubr.msk.bf16.mxu0 %vm235_vm1, %v736_v7  ;;  %670 = vmatpush3.bf16.msra.mxu0 %v738_v1 }
  0x15   : > { %671 = vmatprep.subr.bf16.mxu0 %v739_v3  ;;  %704 = vmatpush3.bf16.msra.mxu1 %v741_v8 }
  0x16   : > { %697 = vmatprep.subr.bf16.mxu1 %v742_v10 }
  0x18   : > { %672 = vmatpush3.bf16.msra.mxu0 %v739_v3 }
  0x19   : > { %673 = vmatprep.subr.bf16.mxu0 %v740_v4  ;;  %705 = vmatpush3.bf16.msra.mxu1 %v742_v10 }
  0x1a   : > { %698 = vmatprep.subr.bf16.mxu1 %v743_v11 }
  0x1b   : > { %666 = vmatmul.mubr.msk.bf16.gmra.mrb[4].mxu0 %vm235_vm1, %v737_v9 }
  0x1c   : > { %674 = vmatpush3.bf16.msra.mxu0 %v740_v4 }
  0x1d   : > { %675 = vmatprep.subr.bf16.mxu0 %v741_v8  ;;  %706 = vmatpush3.bf16.msra.mxu1 %v743_v11 }
  0x1e   : > { %699 = vmatprep.subr.bf16.mxu1 %v744_v12 }
  0x20   : > { %676 = vmatpush3.bf16.msra.mxu0 %v741_v8 }
  0x21   : > { %677 = vmatprep.subr.bf16.mxu0 %v742_v10  ;;  %707 = vmatpush3.bf16.msra.mxu1 %v744_v12 }
  0x22   : > { %700 = vmatprep.subr.bf16.mxu1 %v745_v13 }
  0x24   : > { %678 = vmatpush3.bf16.msra.mxu0 %v742_v10 }
  0x25   : > { %679 = vmatprep.subr.bf16.mxu0 %v743_v11  ;;  %708 = vmatpush3.bf16.msra.mxu1 %v745_v13 }
  0x28   : > { %680 = vmatpush3.bf16.msra.mxu0 %v743_v11 }
  0x29   : > { %681 = vmatprep.subr.bf16.mxu0 %v744_v12 }
  0x2c   : > { %682 = vmatpush3.bf16.msra.mxu0 %v744_v12 }
  0x2d   : > { %683 = vmatprep.subr.bf16.mxu0 %v745_v13 }
  0x30   : > { %684 = vmatpush3.bf16.msra.mxu0 %v745_v13 }
  0xe6   : > { %v663_v14 = vpop.f32.mrb[0].mxu0 }
  0xe7   : > { %v286_v15 = vpop.f32.mrb[1].mxu0  ;;  %v319_v17 = vmax.f32 %v663_v14, 0.0 }
  0xe8   : > { %v664_v16 = vpop.f32.mrb[2].mxu0  ;;  %v317_v20 = vmax.f32 %v286_v15, 0.0 }
  0xe9   : > { %v320_v18 = vmax.f32 %v664_v16, 0.0  ;;  %v289_v19 = vpop.f32.mrb[3].mxu0 }
  0xea   : > { %v318_v21 = vmax.f32 %v289_v19, 0.0 }
  0xeb   : > { %v326_v22 = vpack.c.bf16 %v320_v18, %v319_v17 }
  0xec   : > { %v325_v23 = vpack.c.bf16 %v318_v21, %v317_v20 }
  0xee   : > { %v667_v24 = vpop.f32.mrb[4].mxu0  ;;  %685 = vmatprep.mubr.bf16.mxu0 %v325_v23 }
  0xef   : > { %v302_v25 = vpop.f32.mrb[5].mxu0  ;;  %686 = vmatmul.mubr.bf16.vlgmr.msra.gmra.mrb[8].mxu0 %v326_v22  ;;  %v323_v27 = vmax.f32 %v667_v24, 0.0 }
  0xf0   : > { %v668_v26 = vpop.f32.mrb[6].mxu0  ;;  %v321_v30 = vmax.f32 %v302_v25, 0.0 }
  0xf1   : > { %v324_v28 = vmax.f32 %v668_v26, 0.0  ;;  %v305_v29 = vpop.f32.mrb[7].mxu0 }
  0xf2   : > { %v322_v31 = vmax.f32 %v305_v29, 0.0 }
  0xf3   : > { %v328_v32 = vpack.c.bf16 %v324_v28, %v323_v27 }
  0xf4   : > { %v327_v33 = vpack.c.bf16 %v322_v31, %v321_v30 }
  0xf6   : > { %689 = vmatprep.mubr.bf16.mxu1 %v327_v33 }
  0xf7   : > { %690 = vmatmul.mubr.bf16.vlgmr.msra.gmra.mrb[0].mxu1 %v328_v32 }
 0x1c2   : > { %v687_v34 = vpop.f32.mrb[8].mxu0 }
 0x1c3   : > { %v460_v35 = vmax.f32 %v687_v34, 0.0  ;;  %v427_v36 = vpop.f32.mrb[9].mxu0 }
 0x1c4   : > { %v458_v37 = vmax.f32 %v427_v36, 0.0  ;;  %v688_v38 = vpop.f32.mrb[10].mxu0 }
 0x1c5   : > { %v478_v39 = vrot.slane %v460_v35, 4  ;;  %v461_v40 = vmax.f32 %v688_v38, 0.0  ;;  %v430_v41 = vpop.f32.mrb[11].mxu0 }
 0x1c6   : > { %v466_v42 = vrot.slane %v458_v37, 4  ;;  %v459_v43 = vmax.f32 %v430_v41, 0.0 }
 0x1c7   : > { %v479_v44 = vmax.f32 %v460_v35, %v478_v39  ;;  %v484_v45 = vrot.slane %v461_v40, 4 }
 0x1c8   : > { %v467_v46 = vmax.f32 %v458_v37, %v466_v42  ;;  %v472_v47 = vrot.slane %v459_v43, 4 }
 0x1c9   : > { %v480_v48 = vrot.slane %v479_v44, 2  ;;  %v485_v49 = vmax.f32 %v461_v40, %v484_v45 }
 0x1ca   : > { %v468_v50 = vrot.slane %v467_v46, 2  ;;  %v473_v51 = vmax.f32 %v459_v43, %v472_v47  ;;  %v691_v52 = vpop.f32.mrb[0].mxu1 }
 0x1cb   : > { %v481_v53 = vmax.f32 %v479_v44, %v480_v48  ;;  %v486_v54 = vrot.slane %v485_v49, 2  ;;  %v464_v55 = vmax.f32 %v691_v52, 0.0  ;;  %v443_v56 = vpop.f32.mrb[1].mxu1 }
 0x1cc   : > { %v469_v57 = vmax.f32 %v467_v46, %v468_v50  ;;  %v474_v58 = vrot.slane %v473_v51, 2  ;;  %v462_v59 = vmax.f32 %v443_v56, 0.0  ;;  %v692_v60 = vpop.f32.mrb[2].mxu1 }
 0x1cd   : > { %v487_v61 = vmax.f32 %v485_v49, %v486_v54  ;;  %v502_v62 = vrot.slane %v464_v55, 4  ;;  %v465_v63 = vmax.f32 %v692_v60, 0.0  ;;  %v446_v0 = vpop.f32.mrb[3].mxu1  ;;  %v482_v5 = vrot.slane %v481_v53, 1 }
 0x1ce   : > { %v470_v1 = vrot.slane %v469_v57, 1  ;;  %v475_v2 = vmax.f32 %v473_v51, %v474_v58  ;;  %v490_v3 = vrot.slane %v462_v59, 4  ;;  %v463_v4 = vmax.f32 %v446_v0, 0.0 }
 0x1cf   : > { %v503_v6 = vmax.f32 %v464_v55, %v502_v62  ;;  %v508_v7 = vrot.slane %v465_v63, 4  ;;  %v488_v8 = vrot.slane %v487_v61, 1  ;;  %v483_v18 = vmax.f32 %v481_v53, %v482_v5 }
 0x1d0   : > { %v476_v9 = vrot.slane %v475_v2, 1  ;;  %v491_v10 = vmax.f32 %v462_v59, %v490_v3  ;;  %v496_v11 = vrot.slane %v463_v4, 4  ;;  %v471_v14 = vmax.f32 %v469_v57, %v470_v1 }
 0x1d1   : > { %v504_v12 = vrot.slane %v503_v6, 2  ;;  %v509_v13 = vmax.f32 %v465_v63, %v508_v7  ;;  %v489_v21 = vmax.f32 %v487_v61, %v488_v8 }
 0x1d2   : > { %v477_v15 = vmax.f32 %v475_v2, %v476_v9  ;;  %v492_v16 = vrot.slane %v491_v10, 2  ;;  %v497_v17 = vmax.f32 %v463_v4, %v496_v11 }
 0x1d3   : > { %v505_v19 = vmax.f32 %v503_v6, %v504_v12  ;;  %v510_v20 = vrot.slane %v509_v13, 2 }
 0x1d4   : > { %v523_v22 = vsel %vm522_vm2, %v477_v15, %v471_v14  ;;  %v493_v23 = vmax.f32 %v491_v10, %v492_v16  ;;  %v498_v24 = vrot.slane %v497_v17, 2 }
 0x1d5   : > { %v525_v25 = vsel %vm524_vm3, %v483_v18, %v523_v22  ;;  %v511_v26 = vmax.f32 %v509_v13, %v510_v20  ;;  %v506_v30 = vrot.slane %v505_v19, 1 }
 0x1d6   : > { %v494_v27 = vrot.slane %v493_v23, 1  ;;  %v527_v28 = vsel %vm526_vm4, %v489_v21, %v525_v25  ;;  %v499_v29 = vmax.f32 %v497_v17, %v498_v24 }
 0x1d7   : > { %v512_v32 = vrot.slane %v511_v26, 1  ;;  %v507_v36 = vmax.f32 %v505_v19, %v506_v30 }
 0x1d8   : > { %v495_v31 = vmax.f32 %v493_v23, %v494_v27  ;;  %v500_v33 = vrot.slane %v499_v29, 1 }
 0x1d9   : > { %v513_v37 = vmax.f32 %v511_v26, %v512_v32 }
 0x1da   : > { %v529_v34 = vsel %vm528_vm5, %v495_v31, %v527_v28  ;;  %v501_v35 = vmax.f32 %v499_v29, %v500_v33 }
 0x1dc   : > { %v531_v38 = vsel %vm530_vm6, %v501_v35, %v529_v34 }
 0x1dd   : > { %v533_v39 = vsel %vm532_vm7, %v507_v36, %v531_v38 }
 0x1de   : > { %v535_v40 = vsel %vm534_vm8, %v513_v37, %v533_v39 }
 0x1df   : > { %537 = vst [vmem:[%s204_s18] sm:$0xff] %v535_v40 }
 0x1e0 PF: > { %s13_s14 = sadd.s32 1, %s768_s14   ;;  %s862_s12 = smov %s764_s13 }
 0x1e1   : > { %p10_p5 = scmp.ge.s32.totalorder %s13_s14, 4   ;;  %s863_s13 = smov %s865_s15 }
 0x1e3   :  { %12 = sbr.rel (!%p10_p5) target bundleno = 2 (0x2), region = 62 }

</bundles_post_ra>
